<compile_context>
chip_gen: v7x
topology: tpu7x:2x2x1
jax: 0.10.0
libtpu: 0.0.40
codegen_flags: <defaults>
</compile_context>

<pallas_src>
import functools

import jax
import jax.numpy as jnp
from jax.experimental import pallas as pl
from jax.experimental.pallas import tpu as pltpu

LANE = 128
SUBLANE = 8
MAX_BLOCK_ROWS = 2048  # (2048, 128) f32 tile = 1 MiB per buffer


def _dropout_kernel(seed_ref, x_ref, o_ref, *, p, block_rows):
    """Dropout on one (block_rows, 128) lane-dense tile.

    Random bits come from a stateless hash of the global element index mixed
    with the seed (murmur3 fmix32 finalizer), so tiles are independent and no
    TPU-only stateful PRNG primitive is needed.
    """
    shape = x_ref.shape
    row = jax.lax.broadcasted_iota(jnp.int32, shape, 0).astype(jnp.uint32)
    col = jax.lax.broadcasted_iota(jnp.int32, shape, 1).astype(jnp.uint32)
    base = pl.program_id(0).astype(jnp.uint32) * jnp.uint32(block_rows)
    idx = (base + row) * jnp.uint32(LANE) + col
    seed = seed_ref[0].astype(jnp.uint32)

    # murmur3 fmix32 avalanche over (idx + seed * golden-ratio constant)
    h = idx + seed * jnp.uint32(0x9E3779B9)
    h ^= h >> 16
    h *= jnp.uint32(0x85EBCA6B)
    h ^= h >> 13
    h *= jnp.uint32(0xC2B2AE35)
    h ^= h >> 16

    # keep an element iff its uniform u32 >= p * 2^32   (keep prob = 1 - p)
    threshold = jnp.uint32(min(int(p * (2 ** 32)), 2 ** 32 - 1))
    keep = h >= threshold

    x = x_ref[...]                                   # stay in input dtype
    scale = jnp.asarray(1.0 / (1.0 - p), dtype=x.dtype)
    o_ref[...] = jnp.where(keep, x * scale, jnp.zeros_like(x))


def safe_dropout(x, p, *, seed=0, training=True, apply_during_inference=False):
    """JAX/Pallas equivalent of SafeDropout.forward (inplace is meaningless in JAX)."""
    if not (p > 0 and (training or apply_during_inference)):
        return x  # identity path, exactly like the PyTorch module

    if p >= 1.0:
        # torch F.dropout with p=1 zeroes everything; avoids 1/(1-p) blow-up.
        return jnp.zeros_like(x)

    orig_shape = x.shape
    orig_dtype = x.dtype
    n = x.size

    rows = pl.cdiv(n, LANE)
    block_rows = min(MAX_BLOCK_ROWS, pl.cdiv(rows, SUBLANE) * SUBLANE)
    rows_padded = pl.cdiv(rows, block_rows) * block_rows
    n_pad = rows_padded * LANE

    flat = jnp.ravel(x)
    needs_pad = n_pad != n
    if needs_pad:
        # ragged tail: pad only up to the next block multiple
        flat = jnp.pad(flat, (0, n_pad - n))
    x2 = flat.reshape(rows_padded, LANE)

    grid = (rows_padded // block_rows,)
    seed_arr = jnp.array([seed], dtype=jnp.int32)
    itemsize = jnp.dtype(orig_dtype).itemsize

    out2 = pl.pallas_call(
        functools.partial(_dropout_kernel, p=float(p), block_rows=block_rows),
        out_shape=jax.ShapeDtypeStruct((rows_padded, LANE), orig_dtype),
        grid_spec=pltpu.PrefetchScalarGridSpec(
            num_scalar_prefetch=1,
            grid=grid,
            in_specs=[pl.BlockSpec((block_rows, LANE), lambda i, seed: (i, 0))],
            out_specs=pl.BlockSpec((block_rows, LANE), lambda i, seed: (i, 0)),
        ),
        compiler_params=pltpu.CompilerParams(
            # hash PRNG is stateless per element -> grid steps are independent,
            # so both v7x TensorCores can be used.
            dimension_semantics=("parallel",),
        ),
        cost_estimate=pl.CostEstimate(
            flops=8 * n_pad,
            transcendentals=0,
            bytes_accessed=2 * n_pad * itemsize,
        ),
        input_output_aliases={1: 0},  # x2 (input index 1, after the seed) -> output 0
    )(seed_arr, x2)

    if needs_pad:
        return out2.reshape(-1)[:n].reshape(orig_shape)
    return out2.reshape(orig_shape)


if __name__ == "__main__":
    key = jax.random.PRNGKey(0)
    # SafeDropout takes any tensor; use an NCHW-style activation like the
    # wav2vec conv feature extractor would produce.
    x = jax.random.normal(key, (2, 4, 16, 16), dtype=jnp.float32)

    p = 0.5

    # Training path: dropout kernel runs.
    y_train = safe_dropout(x, p, seed=0, training=True)
    y_train = jax.block_until_ready(y_train)

    # Sanity checks (silent): surviving elements are scaled by 1/(1-p),
    # dropped ones are exactly zero, shape/dtype preserved.
    assert y_train.shape == x.shape and y_train.dtype == x.dtype
    scale = 1.0 / (1.0 - p)
    nz = y_train != 0
    assert bool(jnp.all(jnp.where(nz, jnp.abs(y_train - x * scale) < 1e-5, True)))
    drop_frac = 1.0 - float(jnp.mean(nz.astype(jnp.float32)))
    assert 0.3 < drop_frac < 0.7  # ~p with small-sample slack

    # Eval path: identity, matching `self.training == False` in PyTorch.
    y_eval = safe_dropout(x, p, seed=0, training=False)
    y_eval = jax.block_until_ready(y_eval)
    assert bool(jnp.all(y_eval == x))

    print("KERNEL_OK")
</pallas_src>

<mosaic_0001>
module attributes {stable_mosaic.version = 11 : i64} {
  func.func @_dropout_kernel(%arg0: i32, %arg1: memref<1xi32, #tpu.memory_space<smem>>, %arg2: memref<16x128xf32, #tpu.memory_space<vmem>>, %arg3: memref<16x128xf32, #tpu.memory_space<vmem>>) attributes {dimension_semantics = [#tpu.dimension_semantics<parallel>], iteration_bounds = array<i64: 1>, scalar_prefetch = 1 : i64, scratch_operands = 0 : i64, tpu.core_type = #tpu.core_type<tc>, window_params = [{transform_indices = @transform_0, window_bounds = array<i64: 16, 128>}, {transform_indices = @transform_1, window_bounds = array<i64: 16, 128>}]} {
    %0 = tpu.iota {dimensions = array<i32: 0>} : vector<16x128xi32>
    %1 = tpu.iota {dimensions = array<i32: 1>} : vector<16x128xi32>
    %c16_i32 = arith.constant 16 : i32
    %2 = arith.muli %arg0, %c16_i32 : i32
    %3 = vector.broadcast %2 : i32 to vector<16x128xi32>
    %4 = arith.addi %3, %0 : vector<16x128xi32>
    %c128_i32 = arith.constant 128 : i32
    %5 = vector.broadcast %c128_i32 : i32 to vector<16x128xi32>
    %6 = arith.muli %4, %5 : vector<16x128xi32>
    %7 = arith.addi %6, %1 : vector<16x128xi32>
    %c0 = arith.constant 0 : index
    %8 = memref.load %arg1[%c0] : memref<1xi32, #tpu.memory_space<smem>>
    %c-1640531527_i32 = arith.constant -1640531527 : i32
    %9 = arith.muli %8, %c-1640531527_i32 : i32
    %10 = vector.broadcast %9 : i32 to vector<16x128xi32>
    %11 = arith.addi %7, %10 : vector<16x128xi32>
    %c16_i32_0 = arith.constant 16 : i32
    %12 = vector.broadcast %c16_i32_0 : i32 to vector<16x128xi32>
    %13 = arith.shrui %11, %12 : vector<16x128xi32>
    %14 = arith.xori %11, %13 : vector<16x128xi32>
    %c-2048144789_i32 = arith.constant -2048144789 : i32
    %15 = vector.broadcast %c-2048144789_i32 : i32 to vector<16x128xi32>
    %16 = arith.muli %14, %15 : vector<16x128xi32>
    %c13_i32 = arith.constant 13 : i32
    %17 = vector.broadcast %c13_i32 : i32 to vector<16x128xi32>
    %18 = arith.shrui %16, %17 : vector<16x128xi32>
    %19 = arith.xori %16, %18 : vector<16x128xi32>
    %c-1028477387_i32 = arith.constant -1028477387 : i32
    %20 = vector.broadcast %c-1028477387_i32 : i32 to vector<16x128xi32>
    %21 = arith.muli %19, %20 : vector<16x128xi32>
    %c16_i32_1 = arith.constant 16 : i32
    %22 = vector.broadcast %c16_i32_1 : i32 to vector<16x128xi32>
    %23 = arith.shrui %21, %22 : vector<16x128xi32>
    %24 = arith.xori %21, %23 : vector<16x128xi32>
    %c-2147483648_i32 = arith.constant -2147483648 : i32
    %25 = vector.broadcast %c-2147483648_i32 : i32 to vector<16x128xi32>
    %26 = arith.cmpi uge, %24, %25 : vector<16x128xi32>
    %c0_2 = arith.constant 0 : index
    %c0_3 = arith.constant 0 : index
    %27 = vector.load %arg2[%c0_2, %c0_3] : memref<16x128xf32, #tpu.memory_space<vmem>>, vector<16x128xf32>
    %cst = arith.constant 2.000000e+00 : f32
    %28 = vector.broadcast %cst : f32 to vector<16x128xf32>
    %29 = arith.mulf %27, %28 : vector<16x128xf32>
    %cst_4 = arith.constant 0.000000e+00 : f32
    %30 = vector.broadcast %cst_4 : f32 to vector<16x128xf32>
    %31 = arith.select %26, %29, %30 : vector<16x128xi1>, vector<16x128xf32>
    %c0_5 = arith.constant 0 : index
    %c0_6 = arith.constant 0 : index
    %32 = vector.load %arg3[%c0_5, %c0_6] : memref<16x128xf32, #tpu.memory_space<vmem>>, vector<16x128xf32>
    tpu.vector_store %arg3[%c0_5, %c0_6], %31 {strides = array<i32>} : memref<16x128xf32, #tpu.memory_space<vmem>>, vector<16x128xf32>,
    return
  }
  func.func @transform_0(%arg0: i32, %arg1: memref<1xi32, #tpu.memory_space<smem>>) -> (i32, i32) {
    %c0_i32 = arith.constant 0 : i32
    %c0_i32_0 = arith.constant 0 : i32
    return %arg0, %c0_i32 : i32, i32
  }
  func.func @transform_1(%arg0: i32, %arg1: memref<1xi32, #tpu.memory_space<smem>>) -> (i32, i32) {
    %c0_i32 = arith.constant 0 : i32
    %c0_i32_0 = arith.constant 0 : i32
    return %arg0, %c0_i32 : i32, i32
  }
}

</mosaic_0001>

<bundles_post_ra>
// kernel: tpu_custom_call.1
= control target key start
LH: loop header
LB: loop body
LE: loop exit
PB: predicated region body
PF: predicated region fallthrough
CT: control target
= control target key end

     0   :  { %8 = vsyncpa [#allocation5], 0  ;;  %s190_s0 = inlined_call_operand.<no memory space> [shape: s32[1], index: 0, kind: input, shape index: {}]   ;;  %s191_s1 = inlined_call_operand.hbm [shape: f32[16,128], index: 1, kind: input, shape index: {}, may-alias: {1,2}]   ;;  %s192_s2 = inlined_call_operand.hbm [shape: f32[16,128], index: 2, kind: output, shape index: {}, may-alias: {1,2}]  }
   0x1   :  { %9 = vsyncpa [#allocation6], 0  ;;  %s138_s9 = smov [#allocation4]   ;;  %s90_s13 = scalar_lea.hbm %s191_s1, 256 }
   0x2   :  { %s15_s10 = sshll.u32 %s138_s9, 4  ;;  %p91_p0 = scmp.ne.s32.totalorder %s191_s1, %s90_s13  ;;  %s16_s10 = int_to_ptr.vmem [resolvable:$true] %s15_s10 }
   0x3   :  { %p94_p1 = scmp.lt.u32.totalorder %s90_s13, %s191_s1 }
   0x5   :  { %p96_p2 = pnand %p94_p1, %p91_p0 }
   0x7   :  { %99 = shalt.err (!%p96_p2)
}
   0x8   :  { %s100_s18 = scalar_lea.vmem %s16_s10, 256  ;;  %p105_p4 = scmp.lt.s32.totalorder %s16_s10, %s16_s10 }
   0x9   :  { %p101_p3 = scmp.ne.s32.totalorder %s16_s10, %s100_s18  ;;  %p106_p5 = scmp.lt.s32.totalorder %s100_s18, %s100_s18 }
   0xb   :  { %p107_p6 = por %p106_p5, %p105_p4 }
   0xd   :  { %p108_p7 = pnand %p107_p6, %p101_p3 }
   0xf   :  { %111 = shalt.err (!%p108_p7)
}
  0x10   :  { %s139_s19 = smov 128   ;;  %s140_s20 = smov 8  }
  0x11   :  { %21 = dma.hbm_to_vmem [thread:$0]  %s191_s1, 256, %s16_s10, [#allocation5], %s139_s19, %s139_s19, %s140_s20  }
  0x12   :  { %134 = dma.done.wait [#allocation5], 256  }
  0x13   :  { %135 = vsyncadd [#allocation5], 4294967040  ;;  %v25_v0 = vlaneseq  ;;  %s39_s25 = smul.u32 2654435769, %s190_s0  ;;  %v61_v21 = vld [vmem:[#allocation4] sm:$0xff]  ;;  %v62_v25 = vld [vmem:[#allocation4 + $0x8] sm:$0xff] }
  0x14   :  { %v63_v26 = vmul.f32 2.0, %v61_v21  ;;  %v64_v29 = vmul.f32 2.0, %v62_v25  ;;  %s141_s0 = smov [#allocation7]  }
  0x15   :  { %v26_v1 = vshrl.u32 %v25_v0, 7  ;;  %v29_v2 = vand.u32 127, %v25_v0  ;;  %v40_v5 = vstv %s39_s25  ;;  %s74_s1 = sshll.u32 %s141_s0, 4  ;;  %s75_s1 = int_to_ptr.vmem [resolvable:$true] %s74_s1 }
  0x16   :  { %s112_s26 = scalar_lea.vmem %s75_s1, 256  ;;  %p117_p9 = scmp.lt.s32.totalorder %s75_s1, %s75_s1 }
  0x17   :  { %v34_v3 = vmul.u32 128, %v26_v1  ;;  %v27_v4 = vadd.s32 8, %v26_v1  ;;  %p113_p8 = scmp.ne.s32.totalorder %s75_s1, %s112_s26  ;;  %p118_p10 = scmp.lt.s32.totalorder %s112_s26, %s112_s26 }
  0x19   :  { %v36_v6 = vadd.s32 %v34_v3, %v29_v2  ;;  %v35_v7 = vmul.u32 128, %v27_v4  ;;  %p119_p11 = por %p118_p10, %p117_p9 }
  0x1b   :  { %v41_v8 = vadd.s32 %v40_v5, %v36_v6  ;;  %v37_v9 = vadd.s32 %v35_v7, %v29_v2  ;;  %p120_p12 = pnand %p119_p11, %p113_p8 }
  0x1d   :  { %v43_v10 = vshrl.u32 %v41_v8, 16  ;;  %v42_v11 = vadd.s32 %v40_v5, %v37_v9 }
  0x1f   :  { %v45_v12 = vxor.u32 %v43_v10, %v41_v8  ;;  %v44_v13 = vshrl.u32 %v42_v11, 16 }
  0x21   :  { %v47_v14 = vmul.u32 2246822507, %v45_v12  ;;  %v46_v15 = vxor.u32 %v44_v13, %v42_v11 }
  0x23   :  { %v49_v16 = vshrl.u32 %v47_v14, 13  ;;  %v48_v17 = vmul.u32 2246822507, %v46_v15 }
  0x25   :  { %v51_v18 = vxor.u32 %v49_v16, %v47_v14  ;;  %v50_v19 = vshrl.u32 %v48_v17, 13 }
  0x27   :  { %v53_v20 = vmul.u32 3266489909, %v51_v18  ;;  %v52_v22 = vxor.u32 %v50_v19, %v48_v17 }
  0x29   :  { %v55_v23 = vshrl.u32 %v53_v20, 16  ;;  %v54_v24 = vmul.u32 3266489909, %v52_v22 }
  0x2b   :  { %v57_v27 = vxor.u32 %v55_v23, %v53_v20  ;;  %v56_v28 = vshrl.u32 %v54_v24, 16 }
  0x2d   :  { %vm59_vm0 = vcmp.ge.u32.totalorder %v57_v27, 2147483648  ;;  %v58_v30 = vxor.u32 %v56_v28, %v54_v24 }
  0x2e   :  { %v65_v31 = vsel %vm59_vm0, %v63_v26, 0.0 }
  0x2f   :  { %67 = vst [vmem:[#allocation7] sm:$0xff] %v65_v31  ;;  %vm60_vm1 = vcmp.ge.u32.totalorder %v58_v30, 2147483648 }
  0x30   :  { %v66_v32 = vsel %vm60_vm1, %v64_v29, 0.0 }
  0x31   :  { %68 = vst [vmem:[#allocation7 + $0x8] sm:$0xff] %v66_v32 }
  0x32   :  { %123 = shalt.err (!%p120_p12)
}
  0x33   :  { %s124_s29 = scalar_lea.hbm %s192_s2, 256 }
  0x34   :  { %p125_p13 = scmp.ne.s32.totalorder %s192_s2, %s124_s29  ;;  %p128_p0 = scmp.lt.u32.totalorder %s124_s29, %s192_s2 }
  0x36   :  { %p130_p1 = pnand %p128_p0, %p125_p13 }
  0x38   :  { %133 = shalt.err (!%p130_p1)
}
  0x39   :  { %80 = dma.vmem_to_hbm [thread:$0]  %s75_s1, 256, %s192_s2, [#allocation6], %s139_s19, %s139_s19, %s140_s20  }
  0x3a   :  { %136 = dma.done.wait [#allocation6], 256  }
  0x3b   :  { %137 = vsyncadd [#allocation6], 4294967040 }
  0x3c   :  { %84 = vsyncpa [#allocation5], 1 }
  0x3d   :  { %85 = vsyncpa [#allocation6], 1 }

</bundles_post_ra>
